<compile_context>
chip_gen: v7x
topology: tpu7x:2x2x1
jax: 0.10.0
libtpu: 0.0.40
codegen_flags: <defaults>
</compile_context>

<pallas_src>
import functools

import jax
import jax.numpy as jnp
from jax import lax
from jax.experimental import pallas as pl
from jax.experimental.pallas import tpu as pltpu


_INV_SQRT2 = 0.7071067811865476
_SQRT_2_OVER_PI = 0.7978845608028654
_GELU_TANH_C = 0.044715


def _round_up(x: int, m: int) -> int:
    return ((x + m - 1) // m) * m


def _gelu_f32(x, mode: str):
    """GELU on an f32 tile. 'exact' = erf (PyTorch nn.GELU default)."""
    if mode == "tanh":
        # EUP tanh path (approximate GELU) — gate behind a flag, numerics differ.
        inner = _SQRT_2_OVER_PI * (x + _GELU_TANH_C * x * x * x)
        return 0.5 * x * (1.0 + jnp.tanh(inner))
    return 0.5 * x * (1.0 + lax.erf(x * _INV_SQRT2))


# ----------------------------------------------------------------------------
# Fused MLP kernel: per row tile, run every Linear (+ bias) (+ GELU)
# ----------------------------------------------------------------------------
def _mlp_kernel(x_ref, *refs, num_layers: int, compute_dtype, gelu_mode: str):
    # refs = (w1, b1, [wh, bh]*, w2, b2, o_ref)
    o_ref = refs[-1]
    wb = refs[:-1]
    assert len(wb) == 2 * num_layers

    h = x_ref[...]                                    # (tm, F_in) compute_dtype
    for li in range(num_layers):
        w = wb[2 * li][...]                           # (K, N) compute_dtype
        b = wb[2 * li + 1][...]                       # (1, N) float32
        # MXU matmul with f32 accumulation; bias + GELU epilogue in f32.
        acc = jnp.dot(h, w, preferred_element_type=jnp.float32) + b
        if li < num_layers - 1:
            acc = _gelu_f32(acc, gelu_mode)
            h = acc.astype(compute_dtype)             # back to MXU input dtype
        else:
            h = acc                                   # final layer: no activation
    o_ref[...] = h.astype(o_ref.dtype)


# ----------------------------------------------------------------------------
# One-time parameter preparation (pre-cast + lane padding), done OUTSIDE the
# per-call path so every forward does not pay an HBM pass to convert weights.
# ----------------------------------------------------------------------------
def prepare_mlp_params(params, *, compute_dtype=jnp.bfloat16, lane: int = 128):
    layers = [params["fc1"], *params["hidden"], params["fc2"]]
    out_features = int(layers[-1][0].shape[1])
    n_pad = _round_up(out_features, lane)             # lane-dense output slab

    prepped = []
    for idx, (w, b) in enumerate(layers):
        if idx == len(layers) - 1 and n_pad != out_features:
            w = jnp.pad(w, ((0, 0), (0, n_pad - out_features)))
            b = jnp.pad(b, ((0, n_pad - out_features),))
        prepped.append((jnp.asarray(w, compute_dtype),
                        jnp.asarray(b, jnp.float32).reshape(1, -1)))
    return {
        "layers": tuple(prepped),
        "out_features": out_features,
        "compute_dtype": compute_dtype,
    }


def _vmem_capacity_bytes() -> int:
    try:
        return int(pltpu.get_tpu_info().vmem_capacity_bytes)
    except Exception:
        return 128 * 1024 * 1024                      # conservative default


# ----------------------------------------------------------------------------
# Forward wrapper
# ----------------------------------------------------------------------------
def mlp_forward(prepped, x, *, tm=None, gelu_mode: str = "exact", out_dtype=None):
    """x: (B, S, in_features) -> (B, S, out_features). drop = 0.0 (identity)."""
    layers = prepped["layers"]
    compute_dtype = prepped["compute_dtype"]
    out_features = prepped["out_features"]
    n_pad = int(layers[-1][0].shape[1])               # lane-padded output width

    B, S, F = x.shape
    M = B * S
    out_dtype = out_dtype or x.dtype

    h = x.reshape(M, F).astype(compute_dtype)

    # --- generation-aware tiling / VMEM budget ------------------------------
    vmem_cap = _vmem_capacity_bytes()
    big_vmem = vmem_cap >= 100 * 1024 * 1024          # v5e/v6e (128 MiB) vs v7x (64 MiB)
    if tm is None:
        tm = 512 if big_vmem else 256
    # Ensure >= 2 row tiles whenever M allows it (v7x megacore sharding),
    # and keep the tile sublane-aligned (multiple of 8). No jnp.pad of the
    # activations: Pallas masks the last partial row tile.
    tm_eff = max(8, min(tm, _round_up(pl.cdiv(M, 2), 8)))
    grid_m = pl.cdiv(M, tm_eff)

    cd_bytes = jnp.dtype(compute_dtype).itemsize
    out_bytes = jnp.dtype(out_dtype).itemsize

    # Single-buffered resident weights + double-buffered x/out tiles +
    # f32 & compute-dtype intermediates + headroom.
    weight_vmem = sum(int(w.size) * w.dtype.itemsize + int(b.size) * b.dtype.itemsize
                      for (w, b) in layers)
    io_vmem = 2 * tm_eff * F * cd_bytes + 2 * tm_eff * n_pad * out_bytes
    max_n = max(int(w.shape[1]) for (w, _) in layers)
    interm_vmem = tm_eff * max_n * (4 + cd_bytes)
    vmem_need = weight_vmem + io_vmem + interm_vmem + (4 << 20)
    vmem_ceiling = (112 << 20) if big_vmem else (56 << 20)
    vmem_limit = int(min(max(vmem_need, 32 << 20), vmem_ceiling))

    # --- operands + BlockSpecs ----------------------------------------------
    flat_args = [h]
    in_specs = [pl.BlockSpec((tm_eff, F), lambda i: (i, 0))]      # row tile of x
    for (w, b) in layers:
        k_dim, n_dim = int(w.shape[0]), int(w.shape[1])
        flat_args.append(w)
        flat_args.append(b)
        # Constant index_map => resident across the row grid; single-buffer.
        in_specs.append(pl.BlockSpec((k_dim, n_dim), lambda i: (0, 0),
                                     pipeline_mode=pl.Buffered(1)))
        in_specs.append(pl.BlockSpec((1, n_dim), lambda i: (0, 0),
                                     pipeline_mode=pl.Buffered(1)))

    # Advisory cost estimate for the XLA scheduler.
    flops = int(sum(2 * M * int(w.shape[0]) * int(w.shape[1]) for (w, _) in layers))
    transcendentals = int(sum(M * int(w.shape[1]) for (w, _) in layers[:-1]))
    bytes_accessed = int(M * F * cd_bytes + weight_vmem + M * n_pad * out_bytes)

    kernel = functools.partial(
        _mlp_kernel, num_layers=len(layers), compute_dtype=compute_dtype,
        gelu_mode=gelu_mode)

    out = pl.pallas_call(
        kernel,
        out_shape=jax.ShapeDtypeStruct((M, n_pad), out_dtype),
        grid_spec=pltpu.PrefetchScalarGridSpec(
            num_scalar_prefetch=0,
            grid=(grid_m,),
            in_specs=in_specs,
            out_specs=pl.BlockSpec((tm_eff, n_pad), lambda i: (i, 0)),
        ),
        compiler_params=pltpu.CompilerParams(
            dimension_semantics=("parallel",),
            vmem_limit_bytes=vmem_limit,
        ),
        cost_estimate=pl.CostEstimate(
            flops=flops,
            transcendentals=transcendentals,
            bytes_accessed=bytes_accessed,
        ),
    )(*flat_args)

    # Drop lane padding (no row padding was introduced).
    return out[:, :out_features].reshape(B, S, out_features)


# ----------------------------------------------------------------------------
# Parameters (match PyTorch nn.Linear defaults) and pure-JAX reference
# ----------------------------------------------------------------------------
def init_mlp_params(key, in_features, hidden_features=None, out_features=None,
                    num_hidden_layers=1):
    out_features = out_features or in_features
    hidden_features = hidden_features or in_features

    def init_linear(k, fan_in, fan_out):
        kw, kb = jax.random.split(k)
        bound = 1.0 / jnp.sqrt(fan_in)
        w = jax.random.uniform(kw, (fan_in, fan_out), jnp.float32, -bound, bound)
        b = jax.random.uniform(kb, (fan_out,), jnp.float32, -bound, bound)
        return w, b

    keys = jax.random.split(key, num_hidden_layers + 1)
    return {
        "fc1": init_linear(keys[0], in_features, hidden_features),
        "hidden": [init_linear(keys[i], hidden_features, hidden_features)
                   for i in range(1, num_hidden_layers)],
        "fc2": init_linear(keys[num_hidden_layers], hidden_features, out_features),
    }


def mlp_reference(params, x):
    B, S, F = x.shape
    h = x.reshape(B * S, F)

    def gelu(v):
        return 0.5 * v * (1.0 + lax.erf(v * _INV_SQRT2))

    w1, b1 = params["fc1"]
    h = gelu(h @ w1 + b1)
    for (wh, bh) in params["hidden"]:
        h = gelu(h @ wh + bh)
    w2, b2 = params["fc2"]
    h = h @ w2 + b2
    return h.reshape(B, S, -1)


if __name__ == "__main__":
    key = jax.random.PRNGKey(0)
    k_param, k_x = jax.random.split(key)

    B, S = 2, 8
    in_features, hidden_features, out_features = 32, 64, 32
    num_hidden_layers = 2  # fc1 + one hidden block + fc2

    params = init_mlp_params(k_param, in_features, hidden_features,
                             out_features, num_hidden_layers)
    x = jax.random.normal(k_x, (B, S, in_features), jnp.float32)
    ref = mlp_reference(params, x)

    # Pre-cast / pre-pad parameters ONCE (outside the per-call path).
    prep_f32 = prepare_mlp_params(params, compute_dtype=jnp.float32)
    prep_bf16 = prepare_mlp_params(params, compute_dtype=jnp.bfloat16)

    # 1) f32 compute path, exact-erf GELU: tight tolerance vs reference.
    out_f32 = jax.block_until_ready(mlp_forward(prep_f32, x))
    assert out_f32.shape == (B, S, out_features)
    assert jnp.allclose(out_f32, ref, atol=1e-3, rtol=1e-3)

    # 2) bf16 MXU path (f32 accumulation): looser tolerance.
    out_bf16 = jax.block_until_ready(mlp_forward(prep_bf16, x))
    assert out_bf16.shape == (B, S, out_features)
    assert jnp.allclose(out_bf16, ref, atol=5e-2, rtol=5e-2)

    # 3) ragged row count (B*S not a multiple of the tile / sublane width):
    #    exercises the masked partial-row-tile path (no jnp.pad round trip).
    x_odd = jax.random.normal(k_x, (B, 7, in_features), jnp.float32)
    out_odd = jax.block_until_ready(mlp_forward(prep_f32, x_odd))
    assert jnp.allclose(out_odd, mlp_reference(params, x_odd),
                        atol=1e-3, rtol=1e-3)

    # 4) optional fast epilogue (tanh-approx GELU, EUP-routed) — numerics
    #    intentionally differ slightly from exact erf.
    out_tanh = jax.block_until_ready(mlp_forward(prep_f32, x, gelu_mode="tanh"))
    assert jnp.allclose(out_tanh, ref, atol=5e-2, rtol=5e-2)

    print("KERNEL_OK")
</pallas_src>

<mosaic_0001>
module attributes {stable_mosaic.version = 11 : i64} {
  func.func @_mlp_kernel(%arg0: i32, %arg1: memref<8x32xf32, #tpu.memory_space<vmem>>, %arg2: memref<32x64xf32, #tpu.memory_space<vmem>>, %arg3: memref<1x64xf32, #tpu.memory_space<vmem>>, %arg4: memref<64x64xf32, #tpu.memory_space<vmem>>, %arg5: memref<1x64xf32, #tpu.memory_space<vmem>>, %arg6: memref<64x128xf32, #tpu.memory_space<vmem>>, %arg7: memref<1x128xf32, #tpu.memory_space<vmem>>, %arg8: memref<8x128xf32, #tpu.memory_space<vmem>>) attributes {dimension_semantics = [#tpu.dimension_semantics<parallel>], iteration_bounds = array<i64: 2>, scalar_prefetch = 0 : i64, scratch_operands = 0 : i64, tpu.core_type = #tpu.core_type<tc>, window_params = [{transform_indices = @transform_0, window_bounds = array<i64: 8, 32>}, {pipeline_mode = #tpu.pipeline_mode<synchronous>, transform_indices = @transform_1, window_bounds = array<i64: 32, 64>}, {pipeline_mode = #tpu.pipeline_mode<synchronous>, transform_indices = @transform_2, window_bounds = array<i64: 1, 64>}, {pipeline_mode = #tpu.pipeline_mode<synchronous>, transform_indices = @transform_3, window_bounds = array<i64: 64, 64>}, {pipeline_mode = #tpu.pipeline_mode<synchronous>, transform_indices = @transform_4, window_bounds = array<i64: 1, 64>}, {pipeline_mode = #tpu.pipeline_mode<synchronous>, transform_indices = @transform_5, window_bounds = array<i64: 64, 128>}, {pipeline_mode = #tpu.pipeline_mode<synchronous>, transform_indices = @transform_6, window_bounds = array<i64: 1, 128>}, {transform_indices = @transform_7, window_bounds = array<i64: 8, 128>}]} {
    %c0 = arith.constant 0 : index
    %c0_0 = arith.constant 0 : index
    %0 = vector.load %arg1[%c0, %c0_0] : memref<8x32xf32, #tpu.memory_space<vmem>>, vector<8x32xf32>
    %c0_1 = arith.constant 0 : index
    %c0_2 = arith.constant 0 : index
    %1 = vector.load %arg2[%c0_1, %c0_2] : memref<32x64xf32, #tpu.memory_space<vmem>>, vector<32x64xf32>
    %c0_3 = arith.constant 0 : index
    %c0_4 = arith.constant 0 : index
    %2 = vector.load %arg3[%c0_3, %c0_4] : memref<1x64xf32, #tpu.memory_space<vmem>>, vector<1x64xf32>
    %cst = arith.constant dense<0.000000e+00> : vector<8x64xf32>
    %3 = tpu.matmul %0, %1, %cst {dimension_numbers = #tpu.dot_dimension_numbers<[1], [0], [0], [1], [0, 0, 1, 1], [], []>} : vector<8x32xf32>, vector<32x64xf32>, vector<8x64xf32> -> vector<8x64xf32>
    %4 = vector.broadcast %2 : vector<1x64xf32> to vector<8x64xf32>
    %5 = arith.addf %3, %4 : vector<8x64xf32>
    %cst_5 = arith.constant 5.000000e-01 : f32
    %6 = vector.broadcast %cst_5 : f32 to vector<8x64xf32>
    %7 = arith.mulf %6, %5 : vector<8x64xf32>
    %cst_6 = arith.constant 0.707106769 : f32
    %8 = vector.broadcast %cst_6 : f32 to vector<8x64xf32>
    %9 = arith.mulf %5, %8 : vector<8x64xf32>
    %10 = math.erf %9 : vector<8x64xf32>
    %cst_7 = arith.constant 1.000000e+00 : f32
    %11 = vector.broadcast %cst_7 : f32 to vector<8x64xf32>
    %12 = arith.addf %11, %10 : vector<8x64xf32>
    %13 = arith.mulf %7, %12 : vector<8x64xf32>
    %c0_8 = arith.constant 0 : index
    %c0_9 = arith.constant 0 : index
    %14 = vector.load %arg4[%c0_8, %c0_9] : memref<64x64xf32, #tpu.memory_space<vmem>>, vector<64x64xf32>
    %c0_10 = arith.constant 0 : index
    %c0_11 = arith.constant 0 : index
    %15 = vector.load %arg5[%c0_10, %c0_11] : memref<1x64xf32, #tpu.memory_space<vmem>>, vector<1x64xf32>
    %cst_12 = arith.constant dense<0.000000e+00> : vector<8x64xf32>
    %16 = tpu.matmul %13, %14, %cst_12 {dimension_numbers = #tpu.dot_dimension_numbers<[1], [0], [0], [1], [0, 0, 1, 1], [], []>} : vector<8x64xf32>, vector<64x64xf32>, vector<8x64xf32> -> vector<8x64xf32>
    %17 = vector.broadcast %15 : vector<1x64xf32> to vector<8x64xf32>
    %18 = arith.addf %16, %17 : vector<8x64xf32>
    %cst_13 = arith.constant 5.000000e-01 : f32
    %19 = vector.broadcast %cst_13 : f32 to vector<8x64xf32>
    %20 = arith.mulf %19, %18 : vector<8x64xf32>
    %cst_14 = arith.constant 0.707106769 : f32
    %21 = vector.broadcast %cst_14 : f32 to vector<8x64xf32>
    %22 = arith.mulf %18, %21 : vector<8x64xf32>
    %23 = math.erf %22 : vector<8x64xf32>
    %cst_15 = arith.constant 1.000000e+00 : f32
    %24 = vector.broadcast %cst_15 : f32 to vector<8x64xf32>
    %25 = arith.addf %24, %23 : vector<8x64xf32>
    %26 = arith.mulf %20, %25 : vector<8x64xf32>
    %c0_16 = arith.constant 0 : index
    %c0_17 = arith.constant 0 : index
    %27 = vector.load %arg6[%c0_16, %c0_17] : memref<64x128xf32, #tpu.memory_space<vmem>>, vector<64x128xf32>
    %c0_18 = arith.constant 0 : index
    %c0_19 = arith.constant 0 : index
    %28 = vector.load %arg7[%c0_18, %c0_19] : memref<1x128xf32, #tpu.memory_space<vmem>>, vector<1x128xf32>
    %cst_20 = arith.constant dense<0.000000e+00> : vector<8x128xf32>
    %29 = tpu.matmul %26, %27, %cst_20 {dimension_numbers = #tpu.dot_dimension_numbers<[1], [0], [0], [1], [0, 0, 1, 1], [], []>} : vector<8x64xf32>, vector<64x128xf32>, vector<8x128xf32> -> vector<8x128xf32>
    %30 = vector.broadcast %28 : vector<1x128xf32> to vector<8x128xf32>
    %31 = arith.addf %29, %30 : vector<8x128xf32>
    %c0_21 = arith.constant 0 : index
    %c0_22 = arith.constant 0 : index
    %32 = vector.load %arg8[%c0_21, %c0_22] : memref<8x128xf32, #tpu.memory_space<vmem>>, vector<8x128xf32>
    tpu.vector_store %arg8[%c0_21, %c0_22], %31 {strides = array<i32>} : memref<8x128xf32, #tpu.memory_space<vmem>>, vector<8x128xf32>,
    return
  }
  func.func @transform_0(%arg0: i32) -> (i32, i32) {
    %c0_i32 = arith.constant 0 : i32
    %c0_i32_0 = arith.constant 0 : i32
    return %arg0, %c0_i32 : i32, i32
  }
  func.func @transform_1(%arg0: i32) -> (i32, i32) {
    %c0_i32 = arith.constant 0 : i32
    %c0_i32_0 = arith.constant 0 : i32
    %c0_i32_1 = arith.constant 0 : i32
    return %c0_i32, %c0_i32_0 : i32, i32
  }
  func.func @transform_2(%arg0: i32) -> (i32, i32) {
    %c0_i32 = arith.constant 0 : i32
    %c0_i32_0 = arith.constant 0 : i32
    %c0_i32_1 = arith.constant 0 : i32
    return %c0_i32, %c0_i32_0 : i32, i32
  }
  func.func @transform_3(%arg0: i32) -> (i32, i32) {
    %c0_i32 = arith.constant 0 : i32
    %c0_i32_0 = arith.constant 0 : i32
    %c0_i32_1 = arith.constant 0 : i32
    return %c0_i32, %c0_i32_0 : i32, i32
  }
  func.func @transform_4(%arg0: i32) -> (i32, i32) {
    %c0_i32 = arith.constant 0 : i32
    %c0_i32_0 = arith.constant 0 : i32
    %c0_i32_1 = arith.constant 0 : i32
    return %c0_i32, %c0_i32_0 : i32, i32
  }
  func.func @transform_5(%arg0: i32) -> (i32, i32) {
    %c0_i32 = arith.constant 0 : i32
    %c0_i32_0 = arith.constant 0 : i32
    %c0_i32_1 = arith.constant 0 : i32
    return %c0_i32, %c0_i32_0 : i32, i32
  }
  func.func @transform_6(%arg0: i32) -> (i32, i32) {
    %c0_i32 = arith.constant 0 : i32
    %c0_i32_0 = arith.constant 0 : i32
    %c0_i32_1 = arith.constant 0 : i32
    return %c0_i32, %c0_i32_0 : i32, i32
  }
  func.func @transform_7(%arg0: i32) -> (i32, i32) {
    %c0_i32 = arith.constant 0 : i32
    %c0_i32_0 = arith.constant 0 : i32
    return %arg0, %c0_i32 : i32, i32
  }
}

</mosaic_0001>

<bundles_post_ra>
// kernel: tpu_custom_call.1
= control target key start
LH: loop header
LB: loop body
LE: loop exit
PB: predicated region body
PF: predicated region fallthrough
CT: control target
= control target key end

     0   :  { %12 = vsyncpa [#allocation3], 0  ;;  %s1468_s0 = inlined_call_operand.hbm [shape: f32[16,32], index: 0, kind: input, shape index: {}]   ;;  %s1469_s1 = inlined_call_operand.hbm [shape: f32[32,64], index: 1, kind: input, shape index: {}]   ;;  %s1470_s2 = inlined_call_operand.vmem [shape: f32[1,64], index: 2, kind: input, shape index: {}]   ;;  %s1471_s3 = inlined_call_operand.hbm [shape: f32[64,64], index: 3, kind: input, shape index: {}]   ;;  %s1472_s4 = inlined_call_operand.vmem [shape: f32[1,64], index: 4, kind: input, shape index: {}]   ;;  %s1473_s5 = inlined_call_operand.hbm [shape: f32[64,128], index: 5, kind: input, shape index: {}]   ;;  %s1474_s6 = inlined_call_operand.vmem [shape: f32[1,128], index: 6, kind: input, shape index: {}]   ;;  %s1475_s7 = inlined_call_operand.hbm [shape: f32[16,128], index: 7, kind: output, shape index: {}]  }
   0x1   :  { %14 = vsyncpa [#allocation3 + $0x1], 0 }
   0x2   :  { %15 = vsyncpa [#allocation6], 0 }
   0x3   :  { %16 = vsyncpa [#allocation9], 0 }
   0x4   :  { %17 = vsyncpa [#allocation4], 0 }
   0x5   :  { %19 = vsyncpa [#allocation4 + $0x1], 0  ;;  %s1177_s24 = smov 0   ;;  %s1179_s25 = smov 0  }
   0x6   :  { %s1181_s26 = smov 0   ;;  %s1183_s27 = smov 0  }
   0x7 LB: > { %s1198_s28 = sadd.s32 4294967295, %s1125_s27   ;;  %s725_s29 = sadd.s32 4294967294, %s1125_s27   ;;  %s1125_s27 = sphi %s1183_s27, %s1501_s27   ;;  %s1121_s26 = sphi %s1181_s26, %s1500_s26   ;;  %s1117_s25 = sphi %s1179_s25, %s1499_s25   ;;  %s1113_s24 = sphi %s1177_s24, %s1498_s24  }
   0x8   : > { %p45_p0 = scmp.ne.s32.totalorder %s1117_s25, %s1113_s24  ;;  %p1476_p1 = scmp.eq.s32.totalorder %s1198_s28, 0 }
   0x9   : > { %p201_p3 = scmp.eq.s32.totalorder %s725_s29, 1  ;;  %p726_p5 = scmp.ge.s32.totalorder %s1125_s27, 1 }
   0xa   : > { %p1207_p4 = por %p1476_p1, %p45_p0  ;;  %p208_p7 = scmp.lt.s32.totalorder %s1125_s27, 3 }
   0xb   : > { %p1212_p6 = por %p201_p3, %p45_p0  ;;  %s1127_s10 = smov [#allocation5]  }
   0xc   : > { %s1480_s30 = scalar_select %p1207_p4, 1, 0 }
   0xd   : > { %s1481_s8 = scalar_select %p1212_p6, 1, 0 }
   0xe   : > { %p1217_p8 = pnand %p726_p5, %p208_p7  ;;  %s220_s11 = sshll.u32 %s1127_s10, 4  ;;  %s1221_s11 = int_to_ptr.vmem [resolvable:$true] %s220_s11 }
   0xf   : > { %1482 = sst [smem:[#allocation15_spill]] %s1481_s8  ;;  %s1128_s13 = smov [#allocation7]  }
  0x10   : > { %s1483_s9 = scalar_select %p1217_p8, 1, 0 }
  0x11   : > { %p867_p9 = pneg %p1217_p8  ;;  %s236_s14 = sshll.u32 %s1128_s13, 4  ;;  %s1232_s14 = int_to_ptr.vmem [resolvable:$true] %s236_s14 }
  0x12   : > { %s1129_s15 = smov [#allocation8]   ;;  %s937_s19 = scalar_lea.hbm %s1469_s1, 512 }
  0x13   : > { %p1228_p11 = pnand %p867_p9, %p1476_p1  ;;  %s1234_s16 = sshll.u32 %s1129_s15, 4  ;;  %s253_s16 = int_to_ptr.vmem [resolvable:$true] %s1234_s16 }
  0x14   : > { %p938_p12 = scmp.ne.s32.totalorder %s1469_s1, %s937_s19  ;;  %p944_p5 = scmp.lt.u32.totalorder %s937_s19, %s1469_s1 }
  0x15   : > { %p1244_p13 = pneg %p1228_p11 }
  0x17   : > { %p940_p0 = pnand %p1244_p13, %p938_p12 }
  0x19   : > { %p941_p3 = pneg %p940_p0 }
  0x1b   : > { %p946_p7 = pnand %p944_p5, %p941_p3 }
  0x1d   : > { %949 = shalt.err (!%p946_p7)
}
  0x1e   : > { %s950_s10 = scalar_lea.vmem %s1221_s11, 512  ;;  %p958_p2 = scmp.lt.s32.totalorder %s1221_s11, %s1221_s11 }
  0x1f   : > { %p951_p9 = scmp.ne.s32.totalorder %s1221_s11, %s950_s10  ;;  %p959_p6 = scmp.lt.s32.totalorder %s950_s10, %s950_s10 }
  0x21   : > { %p953_p10 = pnand %p951_p9, %p1244_p13  ;;  %p960_p12 = por %p959_p6, %p958_p2 }
  0x23   : > { %p954_p1 = pneg %p953_p10 }
  0x25   : > { %p961_p0 = pnand %p960_p12, %p954_p1 }
  0x27   : > { %964 = shalt.err (!%p961_p0)
}
  0x28   : > { %s1130_s13 = smov 128   ;;  %s1131_s15 = smov 8  }
  0x29   : > { %870 = dma.hbm_to_vmem [thread:$0]  (!%p1228_p11), %s1469_s1, 512, %s1221_s11, [#allocation6], %s1130_s13, %s1130_s13, %s1131_s15  }
  0x2a   : > { %s965_s21 = scalar_lea.hbm %s1471_s3, 1024 }
  0x2b   : > { %p966_p1 = scmp.ne.s32.totalorder %s1471_s3, %s965_s21  ;;  %p972_p10 = scmp.lt.u32.totalorder %s965_s21, %s1471_s3 }
  0x2d   : > { %p968_p2 = pnand %p966_p1, %p1244_p13 }
  0x2f   : > { %p969_p6 = pneg %p968_p2 }
  0x31   : > { %p974_p3 = pnand %p972_p10, %p969_p6 }
  0x33   : > { %977 = shalt.err (!%p974_p3)
}
  0x34   : > { %s978_s11 = scalar_lea.vmem %s1232_s14, 1024  ;;  %p986_p12 = scmp.lt.s32.totalorder %s1232_s14, %s1232_s14 }
  0x35   : > { %p979_p5 = scmp.ne.s32.totalorder %s1232_s14, %s978_s11  ;;  %p987_p0 = scmp.lt.s32.totalorder %s978_s11, %s978_s11 }
  0x37   : > { %p981_p7 = pnand %p979_p5, %p1244_p13  ;;  %p988_p1 = por %p987_p0, %p986_p12 }
  0x39   : > { %p982_p9 = pneg %p981_p7 }
  0x3b   : > { %p989_p2 = pnand %p988_p1, %p982_p9 }
  0x3d   : > { %992 = shalt.err (!%p989_p2)
}
  0x3e   : > { %873 = dma.hbm_to_vmem [thread:$0]  (!%p1228_p11), %s1471_s3, 1024, %s1232_s14, [#allocation6], %s1130_s13, %s1130_s13, %s1131_s15  }
  0x3f   : > { %s993_s20 = scalar_lea.hbm %s1473_s5, 1024 }
  0x40   : > { %p994_p6 = scmp.ne.s32.totalorder %s1473_s5, %s993_s20  ;;  %p1000_p5 = scmp.lt.u32.totalorder %s993_s20, %s1473_s5 }
  0x42   : > { %p996_p10 = pnand %p994_p6, %p1244_p13 }
  0x44   : > { %p997_p3 = pneg %p996_p10 }
  0x46   : > { %p1002_p7 = pnand %p1000_p5, %p997_p3 }
  0x48   : > { %1005 = shalt.err (!%p1002_p7)
}
  0x49   : > { %s1006_s11 = scalar_lea.vmem %s253_s16, 1024  ;;  %p1014_p1 = scmp.lt.s32.totalorder %s253_s16, %s253_s16 }
  0x4a   : > { %p1007_p9 = scmp.ne.s32.totalorder %s253_s16, %s1006_s11  ;;  %p1015_p2 = scmp.lt.s32.totalorder %s1006_s11, %s1006_s11 }
  0x4c   : > { %p1009_p12 = pnand %p1007_p9, %p1244_p13  ;;  %p1016_p4 = por %p1015_p2, %p1014_p1 }
  0x4e   : > { %p1010_p0 = pneg %p1009_p12 }
  0x50   : > { %p1017_p8 = pnand %p1016_p4, %p1010_p0 }
  0x52   : > { %1020 = shalt.err (!%p1017_p8)
}
  0x53   : > { %876 = dma.hbm_to_vmem [thread:$0]  (!%p1228_p11), %s1473_s5, 1024, %s253_s16, [#allocation9], %s1130_s13, %s1130_s13, %s1131_s15  }
  0x54   : > { %s1317_s22 = sadd.s32 1, %s1125_s27   ;;  %s32_s17 = sadd.s32 1, %s1121_s26 }
  0x55   : > { %s29_s12 = ssub.s32 %s1125_s27, %s1317_s22  ;;  %p39_p8 = scmp.ne.s32.totalorder %s1121_s26, %s1117_s25 }
  0x56   : > { %p30_p4 = scmp.eq.s32.totalorder %s29_s12, 0  ;;  %p40_p13 = scmp.eq.s32.totalorder %s1125_s27, 0 }
  0x57   : > { %p888_p6 = scmp.lt.s32.totalorder %s1125_s27, 2  ;;  %p1486_p3 = scmp.eq.s32.totalorder %s1198_s28, 1 }
  0x58   : > { %s1327_s18 = scalar_select %p30_p4, %s1121_s26, %s32_s17  }
  0x59   : > { %p41_p10 = por %p40_p13, %p39_p8  ;;  %p1331_p5 = por %p1486_p3, %p39_p8 }
  0x5a   : > { %s269_s20 = sand.u32 1, %s1121_s26   ;;  %s732_s21 = sshll.u32 %s1125_s27, 7 }
  0x5b   : > { %s731_s16 = sshll.u32 %s269_s20, 3  ;;  %s1340_s23 = scalar_lea.hbm %s1468_s0, %s732_s21 }
  0x5c   : > { %s273_s29 = scalar_lea.vmem [#allocation2], %s731_s16  ;;  %p1342_p11 = pnand %p888_p6, %p41_p10 }
  0x5d   : > { %s280_s10 = sshll.u32 %s273_s29, 4  ;;  %s270_s14 = scalar_lea.sflag [#allocation3], %s269_s20  ;;  %s1346_s10 = int_to_ptr.vmem [resolvable:$true] %s280_s10 }
  0x5e   : > { %s1021_s8 = scalar_lea.hbm %s1340_s23, 128  ;;  %p1023_p9 = pneg %p1342_p11 }
  0x5f   : > { %p1022_p7 = scmp.ne.s32.totalorder %s1340_s23, %s1021_s8  ;;  %s1026_s21 = scalar_lea.hbm %s1468_s0, 256 }
  0x60   : > { %p1027_p1 = scmp.lt.u32.totalorder %s1340_s23, %s1468_s0  ;;  %p1028_p2 = scmp.lt.u32.totalorder %s1026_s21, %s1021_s8 }
  0x61   : > { %p1024_p12 = pnand %p1023_p9, %p1022_p7  ;;  %p1030_p8 = scmp.lt.u32.totalorder %s1021_s8, %s1340_s23 }
  0x62   : > { %p1029_p4 = por %p1028_p2, %p1027_p1 }
  0x63   : > { %p1025_p0 = pneg %p1024_p12 }
  0x64   : > { %p1031_p13 = por %p1030_p8, %p1029_p4 }
  0x66   : > { %p1032_p6 = pnand %p1031_p13, %p1025_p0 }
  0x68   : > { %1035 = shalt.err (!%p1032_p6)
}
  0x69   : > { %s1036_s20 = scalar_lea.vmem %s1346_s10, 128  ;;  %s1132_s15 = smov [#allocation2]  }
  0x6a   : > { %p1037_p10 = scmp.ne.s32.totalorder %s1346_s10, %s1036_s20  ;;  %s1041_s29 = sshll.u32 %s1132_s15, 4  ;;  %s1042_s29 = int_to_ptr.vmem [resolvable:$false] %s1041_s29 }
  0x6b   : > { %s1043_s12 = scalar_lea.vmem %s1042_s29, 256  ;;  %p1044_p12 = scmp.lt.s32.totalorder %s1346_s10, %s1042_s29 }
  0x6c   : > { %p1039_p3 = pnand %p1037_p10, %p1023_p9  ;;  %p1045_p1 = scmp.lt.s32.totalorder %s1043_s12, %s1036_s20 }
  0x6e   : > { %p1040_p7 = pneg %p1039_p3  ;;  %p1046_p2 = por %p1045_p1, %p1044_p12 }
  0x70   : > { %p1047_p4 = pnand %p1046_p2, %p1040_p7 }
  0x72   : > { %1050 = shalt.err (!%p1047_p4)
}
  0x73   : > { %880 = dma.hbm_to_vmem [thread:$0]  (!%p1342_p11), %s1340_s23, 128, %s1346_s10, %s270_s14  }
  0x74   : > { %p1489_p0 = scmp.ne.s32.totalorder %s1483_s9, 0 }
  0x75   : > { %s1376_s8 = sand.u32 (!%p1489_p0), 1, %s1117_s25   ;;  %p1490_p9 = scmp.ne.s32.totalorder (!%p1489_p0), %s1480_s30, 0 }
  0x76   : > { %289 = sbr.rel (%p1489_p0) target bundleno = 834 (0x342), region = 48  ;;  %s734_s17 = sshll.u32 (!%p1489_p0), %s1376_s8, 3 }
  0x77   : > { %s292_s21 = scalar_lea.sflag (!%p1489_p0), [#allocation3], %s1376_s8  ;;  %s295_s16 = scalar_lea.vmem (!%p1489_p0), [#allocation2], %s734_s17 }
  0x7d   : > { %1096 = dma.done.wait (%p1490_p9), %s292_s21, 128  }
  0x7e   : > { %1098 = vsyncadd (%p1490_p9), %s292_s21, 4294967168  ;;  %p1491_p11 = scmp.eq.s32.totalorder %s1198_s28, 0 }
  0x80   : > { %1100 = dma.done.wait (%p1491_p11), [#allocation6], 1536   ;;  %p1492_p8 = pmov %p1491_p11 }
  0x82   : > { %1102 = vsyncadd (%p1492_p8), [#allocation6], 4294965760  ;;  %p1493_p13 = pmov %p1492_p8 }
  0x83   : > { %p1494_p6 = pmov %p1492_p8 }
  0x84   : > { %1104 = dma.done.wait (%p1493_p13), [#allocation9], 1024  }
  0x85   : > { %1106 = vsyncadd (%p1494_p6), [#allocation9], 4294966272  ;;  %v1133_v0 = vmov 0.0|0.0   ;;  %vm1134_vm0 = vmmov 0   ;;  %v1135_v1 = vmov 0.0   ;;  %v339_v2 = vld [vmem:[#allocation5] sm:$0xff] }
  0x86   : > { %821 = vmatprep.subr.bf16.mxu0 %v1133_v0  ;;  %780 = vmatprep.mubr.msk.f32.mxu0 %vm1134_vm0, %v1135_v1  ;;  %v340_v3 = vld [vmem:[#allocation5 + $0x8] sm:$0xff]  ;;  %v341_v4 = vld [vmem:[#allocation5 + $0x10] sm:$0xff]  ;;  %v342_v6 = vld [vmem:[#allocation5 + $0x18] sm:$0xff]  ;;  %vm350_vm1 = vcmask 261120   ;;  %vm444_vm2 = vcmask 523264   ;;  %s746_s13 = sshll.u32 %s1198_s28, 7 }
  0x87   : > { %827 = vmatprep.subr.bf16.mxu1 %v1133_v0  ;;  %799 = vmatprep.mubr.msk.f32.mxu1 %vm1134_vm0, %v1135_v1  ;;  %v822_v5 = vpack.c.bf16 %v340_v3, %v339_v2  ;;  %v825_v7 = vpack.c.bf16 %v342_v6, %v341_v4  ;;  %v338_v8 = vld [vmem:[%s295_s16] sm:$0xff]  ;;  %v429_v9 = vld [vmem:[#allocation7] sm:$0xff]  ;;  %v430_v10 = vld [vmem:[#allocation7 + $0x8] sm:$0xff]  ;;  %s337_s20 = scalar_lea.vmem [#allocation10], %s734_s17  ;;  %s1424_s21 = scalar_lea.hbm %s1475_s7, %s746_s13 }
  0x88   : > { %v828_v11 = vpack.c.bf16 %v430_v10, %v429_v9  ;;  %v431_v12 = vld [vmem:[#allocation7 + $0x10] sm:$0xff]  ;;  %v432_v13 = vld [vmem:[#allocation7 + $0x18] sm:$0xff]  ;;  %v433_v15 = vld [vmem:[#allocation7 + $0x20] sm:$0xff]  ;;  %s626_s15 = sshll.u32 %s337_s20, 4  ;;  %s613_s16 = scalar_lea.sflag [#allocation4], %s1376_s8  ;;  %s1426_s15 = int_to_ptr.vmem [resolvable:$true] %s626_s15 }
  0x89   : > { %823 = vmatpush3.bf16.msra.mxu0 %v822_v5  ;;  %v831_v14 = vpack.c.bf16 %v432_v13, %v431_v12  ;;  %v434_v16 = vld [vmem:[#allocation7 + $0x28] sm:$0xff]  ;;  %v435_v18 = vld [vmem:[#allocation7 + $0x30] sm:$0xff]  ;;  %v436_v19 = vld [vmem:[#allocation7 + $0x38] sm:$0xff]  ;;  %s1051_s30 = scalar_lea.vmem %s1426_s15, 128  ;;  %s1136_s28 = smov [#allocation10]  }
  0x8a   : > { %824 = vmatprep.subr.bf16.mxu0 %v1133_v0  ;;  %829 = vmatpush3.bf16.msra.mxu1 %v828_v11  ;;  %v834_v17 = vpack.c.bf16 %v434_v16, %v433_v15  ;;  %v837_v20 = vpack.c.bf16 %v436_v19, %v435_v18  ;;  %v739_v21 = vld [vmem:[%s1470_s2] ss:$0 sm:$0xff]  ;;  %v523_v30 = vld [vmem:[#allocation8] sm:$0xff]  ;;  %v524_v31 = vld [vmem:[#allocation8 + $0x8] sm:$0xff]  ;;  %p1052_p10 = scmp.ne.s32.totalorder %s1426_s15, %s1051_s30  ;;  %s1055_s17 = sshll.u32 %s1136_s28, 4  ;;  %s1056_s17 = int_to_ptr.vmem [resolvable:$false] %s1055_s17 }
  0x8b   : > { %830 = vmatprep.subr.bf16.mxu1 %v1133_v0  ;;  %v840_v32 = vpack.c.bf16 %v524_v31, %v523_v30  ;;  %v525_v33 = vld [vmem:[#allocation8 + $0x10] sm:$0xff]  ;;  %v526_v34 = vld [vmem:[#allocation8 + $0x18] sm:$0xff]  ;;  %v527_v36 = vld [vmem:[#allocation8 + $0x20] sm:$0xff]  ;;  %s1057_s9 = scalar_lea.vmem %s1056_s17, 256  ;;  %p1058_p12 = scmp.lt.s32.totalorder %s1426_s15, %s1056_s17 }
  0x8c   : > { %v843_v35 = vpack.c.bf16 %v526_v34, %v525_v33  ;;  %v528_v37 = vld [vmem:[#allocation8 + $0x28] sm:$0xff]  ;;  %v529_v39 = vld [vmem:[#allocation8 + $0x30] sm:$0xff]  ;;  %v530_v40 = vld [vmem:[#allocation8 + $0x38] sm:$0xff]  ;;  %p1053_p3 = pnand %p1052_p10, %p1331_p5  ;;  %p1059_p1 = scmp.lt.s32.totalorder %s1057_s9, %s1051_s30 }
  0x8d   : > { %826 = vmatpush3.bf16.msra.mxu0 %v825_v7  ;;  %v846_v38 = vpack.c.bf16 %v528_v37, %v527_v36  ;;  %v849_v41 = vpack.c.bf16 %v530_v40, %v529_v39  ;;  %v741_v42 = vld [vmem:[%s1472_s4] ss:$0 sm:$0xff] }
  0x8e   : > { %839 = vmatprep.subr.bf16.mxu0 %v1133_v0  ;;  %832 = vmatpush3.bf16.msra.mxu1 %v831_v14  ;;  %v743_v51 = vld [vmem:[%s1474_s6] ss:$0 sm:$0xff]  ;;  %p1054_p7 = pneg %p1053_p3  ;;  %p1060_p2 = por %p1059_p1, %p1058_p12 }
  0x8f   : > { %833 = vmatprep.subr.bf16.mxu1 %v1133_v0 }
  0x90   : > { %781 = vmatmul.mubr.msk.f32.vlgmr.msra.gmra.mrb[0].mxu0 %vm350_vm1, %v338_v8  ;;  %p1061_p4 = pnand %p1060_p2, %p1054_p7 }
  0x91   : > { %818 = vmatprep.mubr.msk.f32.mxu0 %vm1134_vm0, %v1135_v1  ;;  %841 = vmatpush3.bf16.msra.mxu0 %v840_v32 }
  0x92   : > { %835 = vmatpush3.bf16.msra.mxu1 %v834_v17  ;;  %842 = vmatprep.subr.bf16.mxu0 %v1133_v0 }
  0x93   : > { %836 = vmatprep.subr.bf16.mxu1 %v1133_v0 }
  0x95   : > { %844 = vmatpush3.bf16.msra.mxu0 %v843_v35 }
  0x96   : > { %838 = vmatpush3.bf16.msra.mxu1 %v837_v20  ;;  %845 = vmatprep.subr.bf16.mxu0 %v1133_v0 }
  0x99   : > { %847 = vmatpush3.bf16.msra.mxu0 %v846_v38 }
  0x9a   : > { %848 = vmatprep.subr.bf16.mxu0 %v1133_v0 }
  0x9d   : > { %850 = vmatpush3.bf16.msra.mxu0 %v849_v41 }
 0x163   : > { %v420_v22 = vpop.f32.mrb[0].mxu0 }
 0x164   : > { %v421_v23 = vadd.f32 %v739_v21, %v420_v22  ;;  %v782_v24 = vpop.f32.mrb[1].mxu0 }
 0x166   : > { %v425_v25 = vmul.f32 0.70710677, %v421_v23  ;;  %v424_v27 = vmul.f32 0.5, %v421_v23 }
 0x168   : > { %933 = verf.f32 %v425_v25 }
 0x172   : > { %v934_v26 = vpop.eup %933 }
 0x173   : > { %v427_v28 = vadd.f32 1.0, %v934_v26 }
 0x175   : > { %v428_v29 = vmul.f32 %v427_v28, %v424_v27 }
 0x177   : > { %800 = vmatmul.mubr.msk.f32.vlgmr.msra.gmra.mrb[0].mxu1 %vm444_vm2, %v428_v29 }
 0x24a   : > { %v514_v43 = vpop.f32.mrb[0].mxu1 }
 0x24b   : > { %v515_v44 = vadd.f32 %v741_v42, %v514_v43  ;;  %v801_v45 = vpop.f32.mrb[1].mxu1 }
 0x24d   : > { %v519_v46 = vmul.f32 0.70710677, %v515_v44  ;;  %v518_v48 = vmul.f32 0.5, %v515_v44 }
 0x24f   : > { %935 = verf.f32 %v519_v46 }
 0x259   : > { %v936_v47 = vpop.eup %935 }
 0x25a   : > { %v521_v49 = vadd.f32 1.0, %v936_v47 }
 0x25c   : > { %v522_v50 = vmul.f32 %v521_v49, %v518_v48 }
 0x25e   : > { %819 = vmatmul.mubr.msk.f32.vlgmr.msra.gmra.mrb[2].mxu0 %vm444_vm2, %v522_v50 }
 0x331   : > { %v607_v52 = vpop.f32.mrb[2].mxu0 }
 0x332   : > { %v608_v53 = vadd.f32 %v743_v51, %v607_v52  ;;  %v820_v54 = vpop.f32.mrb[3].mxu0 }
 0x334   : > { %611 = vst [vmem:[%s337_s20] sm:$0xff] %v608_v53 }
 0x335   : > { %1064 = shalt.err (!%p1061_p4)
}
 0x336   : > { %s1065_s8 = scalar_lea.hbm %s1424_s21, 128  ;;  %s1069_s11 = scalar_lea.hbm %s1475_s7, 256 }
 0x337   : > { %p1066_p0 = scmp.ne.s32.totalorder %s1424_s21, %s1065_s8  ;;  %p1070_p8 = scmp.lt.u32.totalorder %s1424_s21, %s1475_s7 }
 0x338   : > { %p1071_p13 = scmp.lt.u32.totalorder %s1069_s11, %s1065_s8  ;;  %p1073_p10 = scmp.lt.u32.totalorder %s1065_s8, %s1424_s21 }
 0x339   : > { %p1067_p9 = pnand %p1066_p0, %p1331_p5 }
 0x33a   : > { %p1072_p6 = por %p1071_p13, %p1070_p8 }
 0x33b   : > { %p1068_p11 = pneg %p1067_p9 }
 0x33c   : > { %p1074_p3 = por %p1073_p10, %p1072_p6 }
 0x33e   : > { %p1075_p7 = pnand %p1074_p3, %p1068_p11 }
 0x340   : > { %1078 = shalt.err (!%p1075_p7)
}
 0x341   : > { %865 = dma.vmem_to_hbm [thread:$0]  (%p1331_p5), %s1426_s15, 128, %s1424_s21, %s613_s16  }
 0x342 PF: > { %s1495_s20 = sld [smem:[#allocation15_spill]]  ;;  %s638_s29 = sand.u32 1, %s1113_s24  }
 0x343   : > { %p1497_p1 = scmp.ge.s32.totalorder %s1125_s27, 2  ;;  %s639_s12 = scalar_lea.sflag [#allocation4], %s638_s29 }
 0x348   : > { %p1496_p12 = scmp.ne.s32.totalorder %s1495_s20, 0 }
 0x34a   : > { %p882_p2 = pnand %p1497_p1, %p1496_p12 }
 0x34c   : > { %1108 = dma.done.wait (!%p882_p2), %s639_s12, 128  }
 0x34d   : > { %1110 = vsyncadd (!%p882_p2), %s639_s12, 4294967168  ;;  %p22_p4 = scmp.ge.s32.totalorder %s1317_s22, 4   ;;  %s1498_s24 = smov %s1117_s25 }
 0x34e   : > { %s1499_s25 = smov %s1121_s26  ;;  %s1500_s26 = smov %s1327_s18 }
 0x34f   : > { %s1501_s27 = smov %s1317_s22  ;;  %24 = sbr.rel (!%p22_p4) target bundleno = 7 (0x7), region = 105 }
 0x356   :  { %644 = vsyncpa [#allocation3], 1 }
 0x357   :  { %646 = vsyncpa [#allocation3 + $0x1], 1 }
 0x358   :  { %647 = vsyncpa [#allocation6], 1 }
 0x359   :  { %648 = vsyncpa [#allocation9], 1 }
 0x35a   :  { %649 = vsyncpa [#allocation4], 1 }
 0x35b   :  { %651 = vsyncpa [#allocation4 + $0x1], 1 }

</bundles_post_ra>
